<compile_context>
chip_gen: v6e
topology: v6e:2x2x1
jax: 0.10.0
libtpu: 0.0.40
codegen_flags: <defaults>
</compile_context>

<pallas_src>
import functools
import math

import jax
import jax.numpy as jnp
from jax.experimental import pallas as pl
from jax.experimental.pallas import tpu as pltpu


def _round_up(x, m):
    return (x + m - 1) // m * m


def _rel_pos_emb_kernel(idx_ref, tbl_ref, out_ref, *, group, head_dim, block_diag):
    """One grid step: gather m_block * group tokens into a lane-dense tile.

    idx_ref: (m, group) int32 -- preprocessed in the wrapper (OOB -> -1; for
             the block-diagonal path column j is already offset by j*vocab).
    tbl_ref: block_diag: (group*vocab, group*head_dim) block-diagonal table
             else:       (vocab, head_dim) plain table.
    out_ref: (m, group*head_dim)
    """
    idx = idx_ref[...]
    tbl = tbl_ref[...]
    m = idx.shape[0]
    n_rows = tbl.shape[0]
    lane = jax.lax.broadcasted_iota(jnp.int32, (m, n_rows), 1)

    if block_diag:
        # The k one-hots live in disjoint column ranges of the block-diagonal
        # table, so they can be OR-ed into one matmul operand.
        hot = lane == idx[:, 0:1]
        for j in range(1, group):
            hot = jnp.logical_or(hot, lane == idx[:, j:j + 1])
        one_hot = hot.astype(tbl.dtype)
        out_ref[...] = jnp.dot(
            one_hot, tbl,
            preferred_element_type=jnp.float32,
            precision=jax.lax.Precision.HIGHEST,
        ).astype(out_ref.dtype)
    else:
        # k column-slice matmuls against the shared (V, D) table; the whole
        # (m, k*D) output block is still written back to HBM lane-dense.
        for j in range(group):
            one_hot = (lane == idx[:, j:j + 1]).astype(tbl.dtype)
            col = jnp.dot(
                one_hot, tbl,
                preferred_element_type=jnp.float32,
                precision=jax.lax.Precision.HIGHEST,
            )
            out_ref[:, j * head_dim:(j + 1) * head_dim] = col.astype(out_ref.dtype)


def _choose_group(head_dim, max_row_cols=1024):
    """Tokens per output row so that the row width is a multiple of 128 lanes."""
    if head_dim % 128 == 0:
        return 1
    k = 128 // math.gcd(head_dim, 128)        # == lcm(head_dim, 128) // head_dim
    if k * head_dim > max_row_cols:
        return 1                               # awkward head_dim: masked stores
    return k


def _vmem_capacity_bytes():
    try:
        return int(pltpu.get_tpu_info().vmem_capacity_bytes)
    except Exception:
        return 64 << 20                        # v7x per-TC physical (conservative)


def _plan_tiles(g, k, head_dim, vocab, block_diag, comp_isz, out_isz,
                block_rows=None):
    """Pick grouped rows per grid step from an explicit VMEM plan."""
    kd = k * head_dim
    kd_pad = _round_up(kd, 128)
    v_cols = _round_up(k * vocab if block_diag else vocab, 128)
    # Per grouped row: double-buffered out + idx tiles, plus in-kernel temps
    # (int32 iota, bool accumulate, one-hot in compute dtype, f32 matmul out).
    per_row = (2 * kd_pad * out_isz
               + 2 * 128 * 4
               + v_cols * (4 + 1 + comp_isz)
               + kd_pad * 4)
    tbl_rows = k * vocab if block_diag else vocab
    tbl_cols = kd if block_diag else head_dim
    table_bytes = 2 * _round_up(tbl_rows, 8) * _round_up(tbl_cols, 128) * comp_isz

    vmem_cap = _vmem_capacity_bytes()
    budget = min(vmem_cap // 2, 40 << 20) - table_bytes
    target_out_bytes = 4 << 20                 # ~2-4 MiB of output per grid step

    if block_rows is None:
        rows_t = target_out_bytes // max(kd * out_isz, 1)
        rows_v = budget // max(per_row, 1)
        rows = min(rows_t, rows_v)
    else:
        rows = block_rows
    rows = max(8, (int(rows) // 8) * 8)
    rows = min(rows, _round_up(g, 8))
    if g > 8:                                  # >= 2 grid steps: both v7x TCs busy
        rows = min(rows, _round_up(pl.cdiv(g, 2), 8))
    rows = max(8, rows)

    plan_bytes = table_bytes + rows * per_row
    vmem_limit = int(min(plan_bytes + (8 << 20), vmem_cap - (4 << 20)))
    vmem_limit = max(vmem_limit, 16 << 20)
    return rows, vmem_limit


def relative_position_embedding(indices, embeddings, *, block_rows=None,
                                compute_dtype=None):
    """Pallas equivalent of RelativePositionEmbedding.forward (F.embedding)."""
    indices = jnp.asarray(indices)
    orig_shape = indices.shape
    vocab, head_dim = embeddings.shape
    compute_dtype = embeddings.dtype if compute_dtype is None else jnp.dtype(compute_dtype)
    comp_isz = jnp.dtype(compute_dtype).itemsize
    out_dtype = embeddings.dtype
    out_isz = jnp.dtype(out_dtype).itemsize

    k = _choose_group(head_dim)
    # Block-diagonal grouping only while the grouped table stays tiny
    # (k*V <= 256); otherwise column-slice matmuls avoid the k^2 table.
    block_diag = (k > 1) and (k * vocab <= 256)
    kd = k * head_dim

    # ---- index preprocessing (kept out of the kernel) ----
    idx_flat = indices.astype(jnp.int32).reshape(-1)
    n = idx_flat.size
    idx_flat = jnp.where((idx_flat >= 0) & (idx_flat < vocab), idx_flat, -1)

    g = pl.cdiv(n, k)                                   # grouped rows of k tokens
    m_block, vmem_limit = _plan_tiles(g, k, head_dim, vocab, block_diag,
                                      comp_isz, out_isz, block_rows)
    g_pad = _round_up(max(g, 1), m_block)
    n_pad = g_pad * k
    if n_pad != n:
        idx_flat = jnp.pad(idx_flat, (0, n_pad - n))    # pad with valid index 0
    idx2 = idx_flat.reshape(g_pad, k)
    if block_diag:
        offs = (jnp.arange(k, dtype=jnp.int32) * vocab)[None, :]
        idx2 = jnp.where(idx2 >= 0, idx2 + offs, -1)

    # ---- embedding table ----
    emb_c = embeddings.astype(compute_dtype)
    if block_diag:
        # Row j*V+v carries emb[v] in columns [j*D, (j+1)*D).
        tbl = jnp.einsum("ij,vd->ivjd", jnp.eye(k, dtype=compute_dtype),
                         emb_c).reshape(k * vocab, kd)
    else:
        tbl = emb_c
    tbl_rows, tbl_cols = tbl.shape

    grid = (g_pad // m_block,)
    kernel = functools.partial(_rel_pos_emb_kernel, group=k, head_dim=head_dim,
                               block_diag=block_diag)
    flops = (2 * g_pad * tbl_rows * tbl_cols if block_diag
             else 2 * g_pad * k * vocab * head_dim)

    out = pl.pallas_call(
        kernel,
        out_shape=jax.ShapeDtypeStruct((g_pad, kd), out_dtype),
        grid_spec=pltpu.PrefetchScalarGridSpec(
            num_scalar_prefetch=0,
            grid=grid,
            in_specs=[
                # grouped index block
                pl.BlockSpec((m_block, k), lambda i: (i, 0)),
                # full table; constant block index -> DMA'd once, kept in VMEM
                pl.BlockSpec((tbl_rows, tbl_cols), lambda i: (0, 0)),
            ],
            out_specs=pl.BlockSpec((m_block, kd), lambda i: (i, 0)),
        ),
        compiler_params=pltpu.CompilerParams(
            dimension_semantics=("parallel",),
            vmem_limit_bytes=vmem_limit,
        ),
        cost_estimate=pl.CostEstimate(
            flops=flops,
            transcendentals=0,
            bytes_accessed=(idx2.size * 4 + tbl.size * comp_isz
                            + g_pad * kd * out_isz),
        ),
    )(idx2, tbl)

    # (g_pad, k*D) row-major == (n_pad, D) row-major: drop padding, restore shape.
    out = out.reshape(-1)[: n * head_dim].reshape(*orig_shape, head_dim)
    return out


def make_embeddings(key, max_position, head_dim):
    """Deterministic xavier_normal_ init, matching nn.init.xavier_normal_."""
    v = max_position * 2 + 1
    fan_in, fan_out = head_dim, v   # torch treats dim0 as fan_out, dim1 as fan_in
    std = (2.0 / (fan_in + fan_out)) ** 0.5
    return std * jax.random.normal(key, (v, head_dim), dtype=jnp.float32)


if __name__ == "__main__":
    key = jax.random.PRNGKey(0)
    k_emb, k_idx, k_idx2, k_emb2, k_idx3 = jax.random.split(key, 5)

    # Case 1: small vocab -> block-diagonal grouped path (k=4, k*V=68), 1 step.
    head_dim, max_position = 32, 8
    B, S = 2, 8
    emb = make_embeddings(k_emb, max_position, head_dim)
    idx = jax.random.randint(k_idx, (B, S), 0, 2 * max_position + 1,
                             dtype=jnp.int32)
    out = jax.block_until_ready(relative_position_embedding(idx, emb))
    ref = jnp.take(emb, idx, axis=0)
    assert out.shape == (B, S, head_dim)
    assert jnp.allclose(out, ref, atol=1e-6), "case1: mismatch vs reference gather"

    # Case 2: flattened size not a multiple of the block -> padding + multi-step grid.
    idx2 = jax.random.randint(k_idx2, (3, 67), 0, 2 * max_position + 1,
                              dtype=jnp.int32)
    out2 = jax.block_until_ready(
        relative_position_embedding(idx2, emb, block_rows=16))
    ref2 = jnp.take(emb, idx2, axis=0)
    assert out2.shape == (3, 67, head_dim)
    assert jnp.allclose(out2, ref2, atol=1e-6), "case2: mismatch vs reference gather"

    # Case 3: larger vocab + head_dim=96 -> column-slice path
    #         (k = lcm(96,128)//96 = 4, 384-lane rows, no k^2 table blow-up).
    head_dim3, max_position3 = 96, 100            # vocab = 201, k*vocab > 256
    emb3 = make_embeddings(k_emb2, max_position3, head_dim3)
    idx3 = jax.random.randint(k_idx3, (2, 19), 0, 2 * max_position3 + 1,
                              dtype=jnp.int32)
    out3 = jax.block_until_ready(relative_position_embedding(idx3, emb3))
    ref3 = jnp.take(emb3, idx3, axis=0)
    assert out3.shape == (2, 19, head_dim3)
    assert jnp.allclose(out3, ref3, atol=1e-6), "case3: mismatch vs reference gather"

    print("KERNEL_OK")
</pallas_src>

<mosaic_0001>
module attributes {stable_mosaic.version = 11 : i64} {
  func.func @_rel_pos_emb_kernel(%arg0: i32, %arg1: memref<8x4xi32, #tpu.memory_space<vmem>>, %arg2: memref<68x128xf32, #tpu.memory_space<vmem>>, %arg3: memref<8x128xf32, #tpu.memory_space<vmem>>) attributes {dimension_semantics = [#tpu.dimension_semantics<parallel>], iteration_bounds = array<i64: 1>, scalar_prefetch = 0 : i64, scratch_operands = 0 : i64, tpu.core_type = #tpu.core_type<tc>, window_params = [{transform_indices = @transform_0, window_bounds = array<i64: 8, 4>}, {pipeline_mode = #tpu.pipeline_mode<synchronous>, transform_indices = @transform_1, window_bounds = array<i64: 68, 128>}, {transform_indices = @transform_2, window_bounds = array<i64: 8, 128>}]} {
    %c0 = arith.constant 0 : index
    %c0_0 = arith.constant 0 : index
    %0 = vector.load %arg1[%c0, %c0_0] : memref<8x4xi32, #tpu.memory_space<vmem>>, vector<8x4xi32>
    %c0_1 = arith.constant 0 : index
    %c0_2 = arith.constant 0 : index
    %1 = vector.load %arg2[%c0_1, %c0_2] : memref<68x128xf32, #tpu.memory_space<vmem>>, vector<68x128xf32>
    %2 = tpu.iota {dimensions = array<i32: 1>} : vector<8x68xi32>
    %3 = vector.extract_strided_slice %0 {offsets = [0, 0], sizes = [8, 1], strides = [1, 1]} : vector<8x4xi32> to vector<8x1xi32>
    %4 = vector.broadcast %3 : vector<8x1xi32> to vector<8x68xi32>
    %5 = arith.cmpi eq, %2, %4 : vector<8x68xi32>
    %6 = vector.extract_strided_slice %0 {offsets = [0, 1], sizes = [8, 1], strides = [1, 1]} : vector<8x4xi32> to vector<8x1xi32>
    %7 = vector.broadcast %6 : vector<8x1xi32> to vector<8x68xi32>
    %8 = arith.cmpi eq, %2, %7 : vector<8x68xi32>
    %9 = arith.ori %5, %8 : vector<8x68xi1>
    %10 = vector.extract_strided_slice %0 {offsets = [0, 2], sizes = [8, 1], strides = [1, 1]} : vector<8x4xi32> to vector<8x1xi32>
    %11 = vector.broadcast %10 : vector<8x1xi32> to vector<8x68xi32>
    %12 = arith.cmpi eq, %2, %11 : vector<8x68xi32>
    %13 = arith.ori %9, %12 : vector<8x68xi1>
    %14 = vector.extract_strided_slice %0 {offsets = [0, 3], sizes = [8, 1], strides = [1, 1]} : vector<8x4xi32> to vector<8x1xi32>
    %15 = vector.broadcast %14 : vector<8x1xi32> to vector<8x68xi32>
    %16 = arith.cmpi eq, %2, %15 : vector<8x68xi32>
    %17 = arith.ori %13, %16 : vector<8x68xi1>
    %18 = arith.extui %17 : vector<8x68xi1> to vector<8x68xi32>
    %19 = arith.sitofp %18 : vector<8x68xi32> to vector<8x68xf32>
    %cst = arith.constant dense<0.000000e+00> : vector<8x128xf32>
    %20 = tpu.matmul %19, %1, %cst {dimension_numbers = #tpu.dot_dimension_numbers<[1], [0], [0], [1], [0, 0, 1, 1], [], []>, precision = #tpu.contract_precision<fp32>} : vector<8x68xf32>, vector<68x128xf32>, vector<8x128xf32> -> vector<8x128xf32>
    %c0_3 = arith.constant 0 : index
    %c0_4 = arith.constant 0 : index
    %21 = vector.load %arg3[%c0_3, %c0_4] : memref<8x128xf32, #tpu.memory_space<vmem>>, vector<8x128xf32>
    tpu.vector_store %arg3[%c0_3, %c0_4], %20 {strides = array<i32>} : memref<8x128xf32, #tpu.memory_space<vmem>>, vector<8x128xf32>,
    return
  }
  func.func @transform_0(%arg0: i32) -> (i32, i32) {
    %c0_i32 = arith.constant 0 : i32
    %c0_i32_0 = arith.constant 0 : i32
    return %arg0, %c0_i32 : i32, i32
  }
  func.func @transform_1(%arg0: i32) -> (i32, i32) {
    %c0_i32 = arith.constant 0 : i32
    %c0_i32_0 = arith.constant 0 : i32
    %c0_i32_1 = arith.constant 0 : i32
    return %c0_i32, %c0_i32_0 : i32, i32
  }
  func.func @transform_2(%arg0: i32) -> (i32, i32) {
    %c0_i32 = arith.constant 0 : i32
    %c0_i32_0 = arith.constant 0 : i32
    return %arg0, %c0_i32 : i32, i32
  }
}

</mosaic_0001>

<bundles_post_ra>
// kernel: tpu_custom_call.1
= control target key start
LH: loop header
LB: loop body
LE: loop exit
PB: predicated region body
PF: predicated region fallthrough
CT: control target
= control target key end

     0   :  { %7 = vsyncpa [#allocation3], 0  ;;  %s1128_s0 = inlined_call_operand.vmem [shape: s32[8,4], index: 0, kind: input, shape index: {}]   ;;  %s1129_s1 = inlined_call_operand.hbm [shape: f32[68,128], index: 1, kind: input, shape index: {}]   ;;  %s1130_s2 = inlined_call_operand.hbm [shape: f32[8,128], index: 2, kind: output, shape index: {}]  }
   0x1   :  { %8 = vsyncpa [#allocation4], 0  ;;  %s882_s9 = smov [#allocation2]  }
   0x2   :  { %s16_s10 = sshll.u32 %s882_s9, 4  ;;  %s17_s10 = int_to_ptr.vmem [resolvable:$true] %s16_s10 }
   0x3   :  { %s846_s11 = scalar_lea.vmem %s17_s10, 1152  ;;  %p851_p1 = scmp.lt.s32.totalorder %s17_s10, %s17_s10 }
   0x4   :  { %p847_p0 = scmp.ne.s32.totalorder %s17_s10, %s846_s11  ;;  %p852_p2 = scmp.lt.s32.totalorder %s846_s11, %s846_s11 }
   0x6   :  { %p853_p3 = por %p852_p2, %p851_p1 }
   0x8   :  { %p854_p4 = pnand %p853_p3, %p847_p0 }
   0xa   :  { %857 = shalt.err (!%p854_p4)
}
   0xb   :  { %s883_s12 = smov 128   ;;  %s884_s13 = smov 8  }
   0xc   :  { %22 = dma.hbm_to_vmem [thread:$0]  %s1129_s1, 1152, %s17_s10, [#allocation3], %s883_s12, %s883_s12, %s884_s13  }
   0xd   :  { %878 = dma.done.wait [#allocation3], 1152  }
   0xe   :  { %879 = vsyncadd [#allocation3], 4294966144  ;;  %v885_v0 = vmov 0   ;;  %v886_v1 = vmov 2   ;;  %v887_v2 = vmov 0.0   ;;  %vm63_vm0 = vcmask 1043456  }
   0xf   :  { %833 = vset.pattern.permute.xlu0 %v885_v0  ;;  %835 = vset.pattern.permute.xlu1 %v886_v1  ;;  %v26_v3 = vld [vmem:[%s1128_s0] sm:$0xff]  ;;  %v34_v5 = vld [vmem:[#allocation2 + $0x38] sm:$0xff]  ;;  %v33_v8 = vld [vmem:[#allocation2 + $0x30] sm:$0xff]  ;;  %v888_v25 = vmov 1   ;;  %v889_v26 = vmov 3   ;;  %vm890_vm1 = vmmov 0   ;;  %v36_v61 = vlaneseq }
  0x10   :  { %718 = vmatprep.subr.mxu1 %v887_v2  ;;  %697 = vmatprep.subr.mxu0 %v887_v2  ;;  %v35_v4 = vld [vmem:[#allocation2 + $0x40] sm:$0xf]  ;;  %v915_v7 = vand.u32 4294901760, %v34_v5  ;;  %v32_v9 = vld [vmem:[#allocation2 + $0x28] sm:$0xff]  ;;  %v919_v12 = vand.u32 4294901760, %v33_v8  ;;  %v30_v15 = vld [vmem:[#allocation2 + $0x18] sm:$0xff] }
  0x11   :  { %39 = vperm.xlu0 %833, %v26_v3   ;;  %48 = vperm.xlu1 %835, %v26_v3   ;;  %v65_v6 = vsel %vm63_vm0, %v35_v4, 0  ;;  %v31_v10 = vld [vmem:[#allocation2 + $0x20] sm:$0xff]  ;;  %v921_v13 = vand.u32 4294901760, %v32_v9  ;;  %v29_v16 = vld [vmem:[#allocation2 + $0x10] sm:$0xff]  ;;  %v928_v18 = vand.u32 4294901760, %v30_v15  ;;  %v28_v20 = vld [vmem:[#allocation2 + $0x8] sm:$0xff] }
  0x12   :  { %v917_v11 = vand.u32 4294901760, %v65_v6  ;;  %v923_v14 = vand.u32 4294901760, %v31_v10  ;;  %v926_v17 = vsub.f32 %v34_v5, %v915_v7  ;;  %v930_v19 = vand.u32 4294901760, %v29_v16  ;;  %v27_v38 = vld [vmem:[#allocation2] sm:$0xff]  ;;  %736 = vmatprep.mubr.msk.f32.mxu1 %vm890_vm1, %v887_v2  ;;  %715 = vmatprep.mubr.msk.f32.mxu0 %vm890_vm1, %v887_v2  ;;  %s891_s0 = smov [#allocation5]  }
  0x13   :  { %v936_v22 = vsub.f32 %v33_v8, %v919_v12  ;;  %v939_v23 = vsub.f32 %v32_v9, %v921_v13  ;;  %v947_v28 = vsub.f32 %v30_v15, %v928_v18  ;;  %v952_v32 = vand.u32 4294901760, %v28_v20  ;;  %s624_s1 = sshll.u32 %s891_s0, 4  ;;  %s625_s1 = int_to_ptr.vmem [resolvable:$true] %s624_s1 }
  0x14   :  { %v933_v21 = vsub.f32 %v65_v6, %v917_v11  ;;  %v942_v24 = vsub.f32 %v31_v10, %v923_v14  ;;  %698 = vmatpush3.msra.mxu0 %v917_v11  ;;  %v175_v27 = vand.u32 4294901760, %v926_v17  ;;  %v967_v37 = vsub.f32 %v29_v16, %v930_v19  ;;  %s858_s18 = scalar_lea.vmem %s625_s1, 128  ;;  %p863_p6 = scmp.lt.s32.totalorder %s625_s1, %s625_s1 }
  0x15   :  { %834 = vset.pattern.permute.xlu0 %v888_v25  ;;  %836 = vset.pattern.permute.xlu1 %v889_v26  ;;  %v182_v30 = vand.u32 4294901760, %v936_v22  ;;  %v189_v31 = vand.u32 4294901760, %v939_v23  ;;  %v203_v39 = vand.u32 4294901760, %v947_v28  ;;  %v976_v43 = vsub.f32 %v28_v20, %v952_v32  ;;  %p859_p5 = scmp.ne.s32.totalorder %s625_s1, %s858_s18  ;;  %p864_p7 = scmp.lt.s32.totalorder %s858_s18, %s858_s18 }
  0x16   :  { %43 = vperm.xlu0 %834, %v26_v3   ;;  %53 = vperm.xlu1 %836, %v26_v3   ;;  %v168_v29 = vand.u32 4294901760, %v933_v21  ;;  %v176_v33 = vsub.f32 %v926_v17, %v175_v27  ;;  %v196_v36 = vand.u32 4294901760, %v942_v24  ;;  %v979_v44 = vand.u32 4294901760, %v27_v38 }
  0x17   :  { %699 = vmatprep.subr.mxu0 %v887_v2  ;;  %v183_v35 = vsub.f32 %v936_v22, %v182_v30  ;;  %v190_v42 = vsub.f32 %v939_v23, %v189_v31  ;;  %v210_v47 = vand.u32 4294901760, %v967_v37  ;;  %v204_v50 = vsub.f32 %v947_v28, %v203_v39  ;;  %p865_p8 = por %p864_p7, %p863_p6 }
  0x18   :  { %v169_v34 = vsub.f32 %v933_v21, %v168_v29  ;;  %700 = vmatpush3.msra.mxu0 %v915_v7  ;;  %v177_v41 = vand.u32 4294901760, %v176_v33  ;;  %v197_v46 = vsub.f32 %v942_v24, %v196_v36  ;;  %v989_v48 = vsub.f32 %v27_v38, %v979_v44 }
  0x19   :  { %701 = vmatprep.subr.mxu0 %v887_v2  ;;  %v184_v45 = vand.u32 4294901760, %v183_v35  ;;  %v191_v49 = vand.u32 4294901760, %v190_v42  ;;  %v217_v51 = vand.u32 4294901760, %v976_v43  ;;  %v211_v53 = vsub.f32 %v967_v37, %v210_v47  ;;  %p866_p9 = pnand %p865_p8, %p859_p5 }
  0x1a   :  { %v170_v40 = vand.u32 4294901760, %v169_v34  ;;  %702 = vmatpush3.msra.mxu0 %v919_v12  ;;  %837 = vset.pattern.permute.xlu0 %v889_v26  ;;  %v198_v52 = vand.u32 4294901760, %v197_v46  ;;  %v224_v54 = vand.u32 4294901760, %v989_v48  ;;  %v205_v55 = vand.u32 4294901760, %v204_v50 }
  0x1b   :  { %703 = vmatprep.subr.mxu0 %v887_v2  ;;  %v218_v56 = vsub.f32 %v976_v43, %v217_v51  ;;  %v212_v57 = vand.u32 4294901760, %v211_v53  ;;  %v37_v0 = vand.u32 127, %v36_v61  ;;  %vm59_vm8 = vcmask 556032  }
  0x1c   :  { %719 = vmatpush3.msra.mxu1 %v170_v40  ;;  %704 = vmatpush3.msra.mxu0 %v921_v13  ;;  %v225_v58 = vsub.f32 %v989_v48, %v224_v54 }
  0x1d   :  { %720 = vmatprep.subr.mxu1 %v887_v2  ;;  %705 = vmatprep.subr.mxu0 %v887_v2  ;;  %v219_v59 = vand.u32 4294901760, %v218_v56 }
  0x1e   :  { %721 = vmatpush3.msra.mxu1 %v177_v41  ;;  %706 = vmatpush3.msra.mxu0 %v923_v14  ;;  %v226_v60 = vand.u32 4294901760, %v225_v58 }
  0x1f   :  { %722 = vmatprep.subr.mxu1 %v887_v2  ;;  %707 = vmatprep.subr.mxu0 %v887_v2 }
  0x20   :  { %723 = vmatpush3.msra.mxu1 %v184_v45  ;;  %708 = vmatpush3.msra.mxu0 %v928_v18 }
  0x21   :  { %724 = vmatprep.subr.mxu1 %v887_v2  ;;  %709 = vmatprep.subr.mxu0 %v887_v2 }
  0x22   :  { %725 = vmatpush3.msra.mxu1 %v191_v49  ;;  %710 = vmatpush3.msra.mxu0 %v930_v19 }
  0x23   :  { %726 = vmatprep.subr.mxu1 %v887_v2  ;;  %711 = vmatprep.subr.mxu0 %v887_v2 }
  0x24   :  { %727 = vmatpush3.msra.mxu1 %v198_v52  ;;  %712 = vmatpush3.msra.mxu0 %v952_v32 }
  0x25   :  { %728 = vmatprep.subr.mxu1 %v887_v2  ;;  %713 = vmatprep.subr.mxu0 %v887_v2 }
  0x26   :  { %729 = vmatpush3.msra.mxu1 %v205_v55  ;;  %714 = vmatpush3.msra.mxu0 %v979_v44 }
  0x27   :  { %730 = vmatprep.subr.mxu1 %v887_v2  ;;  %739 = vmatprep.subr.mxu0 %v887_v2 }
  0x28   :  { %731 = vmatpush3.msra.mxu1 %v212_v57 }
  0x29   :  { %732 = vmatprep.subr.mxu1 %v887_v2 }
  0x2a   :  { %733 = vmatpush3.msra.mxu1 %v219_v59 }
  0x2b   :  { %734 = vmatprep.subr.mxu1 %v887_v2 }
  0x2c   :  { %735 = vmatpush3.msra.mxu1 %v226_v60 }
  0x2d   :  { %760 = vmatprep.subr.mxu1 %v887_v2 }
  0x8c   :  { %v40_v62 = vpop.permute.xlu0 %39  ;;  %v49_v63 = vpop.permute.xlu1 %48 }
  0x8d   :  { %vm41_vm2 = vcmp.eq.s32.totalorder %v37_v0, %v40_v62  ;;  %vm50_vm5 = vcmp.eq.s32.totalorder %v37_v0, %v49_v63 }
  0x91   :  { %v44_v1 = vpop.permute.xlu0 %43  ;;  %v54_v3 = vpop.permute.xlu1 %53 }
  0x92   :  { %vm45_vm3 = vcmp.eq.s32.totalorder %v37_v0, %v44_v1  ;;  %vm55_vm4 = vcmp.eq.s32.totalorder %v37_v0, %v54_v3 }
  0x93   :  { %vm46_vm6 = vmor %vm41_vm2, %vm45_vm3 }
  0x94   :  { %vm51_vm7 = vmor %vm46_vm6, %vm50_vm5 }
  0x95   :  { %vm56_vm9 = vmor %vm51_vm7, %vm55_vm4 }
  0x96   :  { %v1028_v4 = vsel %vm56_vm9, 1.0, %v887_v2 }
  0x97   :  { %v61_v5 = vsel %vm59_vm8, %v1028_v4, 0  ;;  %737 = vmatmul.mubr.msk.f32.vlgmr.msra.gmra.mxu1 %vm59_vm8, %v1028_v4 }
  0x98   :  { %v142_v6 = vsub.f32 %v61_v5, %v61_v5  ;;  %761 = vmatpush3.msra.mxu1 %v917_v11  ;;  %778 = vmatprep.mubr.msk.f32.mxu1 %vm890_vm1, %v887_v2 }
  0x99   :  { %762 = vmatprep.subr.mxu1 %v887_v2 }
  0x9a   :  { %763 = vmatpush3.msra.mxu1 %v915_v7  ;;  %v143_v8 = vand.u32 4294901760, %v142_v6 }
  0x9b   :  { %764 = vmatprep.subr.mxu1 %v887_v2 }
  0x9c   :  { %765 = vmatpush3.msra.mxu1 %v919_v12  ;;  %v144_v9 = vsub.f32 %v142_v6, %v143_v8 }
  0x9d   :  { %766 = vmatprep.subr.mxu1 %v887_v2 }
  0x9e   :  { %767 = vmatpush3.msra.mxu1 %v921_v13  ;;  %v145_v10 = vand.u32 4294901760, %v144_v9 }
  0x9f   :  { %768 = vmatprep.subr.mxu1 %v887_v2 }
  0xa0   :  { %769 = vmatpush3.msra.mxu1 %v923_v14  ;;  %716 = vmatmul.mubr.f32.vlgmr.msra.gmra.mxu0 %v145_v10 }
  0xa1   :  { %740 = vmatpush3.msra.mxu0 %v933_v21  ;;  %770 = vmatprep.subr.mxu1 %v887_v2 }
  0xa2   :  { %741 = vmatprep.subr.mxu0 %v887_v2  ;;  %771 = vmatpush3.msra.mxu1 %v928_v18 }
  0xa3   :  { %742 = vmatpush3.msra.mxu0 %v926_v17  ;;  %772 = vmatprep.subr.mxu1 %v887_v2 }
  0xa4   :  { %743 = vmatprep.subr.mxu0 %v887_v2  ;;  %773 = vmatpush3.msra.mxu1 %v930_v19 }
  0xa5   :  { %744 = vmatpush3.msra.mxu0 %v936_v22  ;;  %774 = vmatprep.subr.mxu1 %v887_v2 }
  0xa6   :  { %745 = vmatprep.subr.mxu0 %v887_v2  ;;  %775 = vmatpush3.msra.mxu1 %v952_v32 }
  0xa7   :  { %746 = vmatpush3.msra.mxu0 %v939_v23  ;;  %776 = vmatprep.subr.mxu1 %v887_v2 }
  0xa8   :  { %747 = vmatprep.subr.mxu0 %v887_v2  ;;  %777 = vmatpush3.msra.mxu1 %v979_v44 }
  0xa9   :  { %748 = vmatpush3.msra.mxu0 %v942_v24  ;;  %779 = vmatmul.mubr.f32.vlgmr.msra.gmra.mxu1 %v143_v8 }
  0xaa   :  { %802 = vmatprep.subr.mxu1 %v887_v2  ;;  %749 = vmatprep.subr.mxu0 %v887_v2 }
  0xab   :  { %803 = vmatpush3.msra.mxu1 %v917_v11  ;;  %750 = vmatpush3.msra.mxu0 %v947_v28 }
  0xac   :  { %804 = vmatprep.subr.mxu1 %v887_v2  ;;  %751 = vmatprep.subr.mxu0 %v887_v2 }
  0xad   :  { %805 = vmatpush3.msra.mxu1 %v915_v7  ;;  %752 = vmatpush3.msra.mxu0 %v967_v37 }
  0xae   :  { %806 = vmatprep.subr.mxu1 %v887_v2  ;;  %753 = vmatprep.subr.mxu0 %v887_v2 }
  0xaf   :  { %807 = vmatpush3.msra.mxu1 %v919_v12  ;;  %754 = vmatpush3.msra.mxu0 %v976_v43 }
  0xb0   :  { %808 = vmatprep.subr.mxu1 %v887_v2  ;;  %755 = vmatprep.subr.mxu0 %v887_v2 }
  0xb1   :  { %809 = vmatpush3.msra.mxu1 %v921_v13  ;;  %756 = vmatpush3.msra.mxu0 %v989_v48 }
  0xb2   :  { %757 = vmatprep.mubr.msk.f32.mxu0 %vm890_vm1, %v887_v2  ;;  %810 = vmatprep.subr.mxu1 %v887_v2 }
  0xb3   :  { %758 = vmatmul.mubr.f32.vlgmr.msra.gmra.mxu0 %v142_v6  ;;  %781 = vmatprep.subr.mxu0 %v887_v2 }
  0xb4   :  { %811 = vmatpush3.msra.mxu1 %v923_v14  ;;  %782 = vmatpush3.msra.mxu0 %v168_v29 }
  0xb5   :  { %812 = vmatprep.subr.mxu1 %v887_v2  ;;  %783 = vmatprep.subr.mxu0 %v887_v2 }
  0xb6   :  { %813 = vmatpush3.msra.mxu1 %v928_v18  ;;  %784 = vmatpush3.msra.mxu0 %v175_v27 }
  0xb7   :  { %814 = vmatprep.subr.mxu1 %v887_v2  ;;  %785 = vmatprep.subr.mxu0 %v887_v2 }
  0xb8   :  { %815 = vmatpush3.msra.mxu1 %v930_v19  ;;  %786 = vmatpush3.msra.mxu0 %v182_v30 }
  0xb9   :  { %816 = vmatprep.subr.mxu1 %v887_v2  ;;  %787 = vmatprep.subr.mxu0 %v887_v2 }
  0xba   :  { %817 = vmatpush3.msra.mxu1 %v952_v32  ;;  %788 = vmatpush3.msra.mxu0 %v189_v31 }
  0xbb   :  { %818 = vmatprep.subr.mxu1 %v887_v2  ;;  %789 = vmatprep.subr.mxu0 %v887_v2 }
  0xbc   :  { %819 = vmatpush3.msra.mxu1 %v979_v44  ;;  %820 = vmatprep.mubr.msk.f32.mxu1 %vm890_vm1, %v887_v2 }
  0xbd   :  { %790 = vmatpush3.msra.mxu0 %v196_v36  ;;  %821 = vmatmul.mubr.msk.f32.vlgmr.msra.gmra.mxu1 %vm59_vm8, %v1028_v4 }
  0xbe   :  { %791 = vmatprep.subr.mxu0 %v887_v2  ;;  %799 = vmatprep.mubr.msk.f32.mxu0 %vm890_vm1, %v887_v2 }
  0xbf   :  { %792 = vmatpush3.msra.mxu0 %v203_v39 }
  0xc0   :  { %793 = vmatprep.subr.mxu0 %v887_v2 }
  0xc1   :  { %794 = vmatpush3.msra.mxu0 %v210_v47 }
  0xc2   :  { %795 = vmatprep.subr.mxu0 %v887_v2 }
  0xc3   :  { %796 = vmatpush3.msra.mxu0 %v217_v51 }
  0xc4   :  { %797 = vmatprep.subr.mxu0 %v887_v2 }
  0xc5   :  { %798 = vmatpush3.msra.mxu0 %v224_v54 }
  0xc6   :  { %800 = vmatmul.mubr.msk.f32.vlgmr.msra.gmra.mxu0 %vm59_vm8, %v1028_v4 }
 0x157   :  { %v263_v7 = vpop.f32.mrf.mxu1 }
 0x159   :  { %v738_v11 = vpop.f32.mrf.mxu1 }
 0x160   :  { %v147_v12 = vpop.f32.mrf.mxu0 }
 0x161   :  { %v264_v19 = vadd.f32 %v263_v7, %v147_v12 }
 0x162   :  { %v717_v13 = vpop.f32.mrf.mxu0 }
 0x169   :  { %v435_v14 = vpop.f32.mrf.mxu1 }
 0x16b   :  { %v780_v15 = vpop.f32.mrf.mxu1 }
 0x173   :  { %v353_v16 = vpop.f32.mrf.mxu0 }
 0x174   :  { %v354_v21 = vadd.f32 %v353_v16, %v264_v19 }
 0x175   :  { %v759_v17 = vpop.f32.mrf.mxu0 }
 0x176   :  { %v436_v22 = vadd.f32 %v435_v14, %v354_v21 }
 0x17d   :  { %v613_v18 = vpop.f32.mrf.mxu1 }
 0x17f   :  { %v822_v20 = vpop.f32.mrf.mxu1 }
 0x186   :  { %v533_v2 = vpop.f32.mrf.mxu0 }
 0x187   :  { %v534_v23 = vadd.f32 %v533_v2, %v436_v22 }
 0x188   :  { %v801_v24 = vpop.f32.mrf.mxu0 }
 0x189   :  { %v614_v25 = vadd.f32 %v613_v18, %v534_v23 }
 0x18b   :  { %617 = vst [vmem:[#allocation5] sm:$0xff] %v614_v25 }
 0x18c   :  { %869 = shalt.err (!%p866_p9)
}
 0x18d   :  { %627 = dma.vmem_to_hbm [thread:$0]  %s625_s1, 128, %s1130_s2, [#allocation4]  }
 0x18e   :  { %880 = dma.done.wait [#allocation4], 128  }
 0x18f   :  { %881 = vsyncadd [#allocation4], 4294967168 }
 0x190   :  { %631 = vsyncpa [#allocation3], 1 }
 0x191   :  { %632 = vsyncpa [#allocation4], 1 }

</bundles_post_ra>
